<compile_context>
chip_gen: v7x
topology: tpu7x:2x2x1
jax: 0.10.0
libtpu: 0.0.40
codegen_flags: <defaults>
</compile_context>

<pallas_src>
import math
from functools import partial

import jax
import jax.numpy as jnp
from jax.experimental import pallas as pl
from jax.experimental.pallas import tpu as pltpu


def _round_up(x, m):
    return ((x + m - 1) // m) * m


def _gelu_exact(x):
    # PyTorch F.gelu default = exact erf-based GELU.
    return 0.5 * x * (1.0 + jax.lax.erf(x * (1.0 / math.sqrt(2.0))))


def _ff_kernel(x_ref, w1v_ref, w1g_ref, b1v_ref, b1g_ref, w2_ref, b2_ref,
               o_ref, acc_ref):
    # x_ref : (TM, H)            w1v_ref/w1g_ref: (H, TI)   b1v/b1g: (1, TI)
    # w2_ref: (TI, H)            b2_ref: (1, H)
    # o_ref : (TM, H)            acc_ref: (TM, H) f32 scratch
    k = pl.program_id(1)

    @pl.when(k == 0)
    def _():
        acc_ref[...] = jnp.zeros_like(acc_ref)

    x = x_ref[...]
    # First projection, split into value / gate halves (no lane slicing).
    val = jnp.dot(x, w1v_ref[...], preferred_element_type=jnp.float32) + b1v_ref[...]
    gate = jnp.dot(x, w1g_ref[...], preferred_element_type=jnp.float32) + b1g_ref[...]

    # GEGLU.
    z = val * _gelu_exact(gate)

    # Dropout(p=0.0) is the identity.
    # TODO(synk): p>0 training dropout would need pltpu.prng_seed/prng_random_bits masking.

    # Partial second projection for this inner-dim slice, accumulated in f32.
    acc_ref[...] += jnp.dot(z.astype(w2_ref.dtype), w2_ref[...],
                            preferred_element_type=jnp.float32)

    @pl.when(k == pl.num_programs(1) - 1)
    def _():
        o_ref[...] = (acc_ref[...] + b2_ref[...]).astype(o_ref.dtype)


def feed_forward(x, w1, b1, w2, b2, *, tm_cap=256, ti_cap=512):
    """x: (batch, seq, hidden). Returns (batch, seq, hidden)."""
    batch, seq, hidden = x.shape
    inner = w2.shape[0]                      # hidden * multiplier
    assert w1.shape == (hidden, 2 * inner)
    M = batch * seq
    itemsize = jnp.dtype(x.dtype).itemsize

    # Cost estimate from the *unpadded* problem.
    flops = 2 * M * hidden * (2 * inner) + 2 * M * inner * hidden
    bytes_accessed = (M * hidden * 2 + w1.size + b1.size + w2.size + b2.size) * itemsize

    # Split W1 / b1 into value and gate halves in the wrapper (free).
    w1_val, w1_gate = w1[:, :inner], w1[:, inner:]
    b1_val = b1[:inner].reshape(1, inner)
    b1_gate = b1[inner:].reshape(1, inner)
    b2_2d = b2.reshape(1, hidden)

    # Tile sizes: sublane dims multiples of 8, lane dims multiples of 128.
    TM = min(tm_cap, _round_up(M, 8))
    TI = min(ti_cap, _round_up(inner, 128))
    Mp = _round_up(M, TM)
    Ip = _round_up(inner, TI)

    x2d = x.reshape(M, hidden)
    if Mp != M:
        x2d = jnp.pad(x2d, ((0, Mp - M), (0, 0)))
    if Ip != inner:
        pad_i = Ip - inner
        w1_val = jnp.pad(w1_val, ((0, 0), (0, pad_i)))
        w1_gate = jnp.pad(w1_gate, ((0, 0), (0, pad_i)))
        b1_val = jnp.pad(b1_val, ((0, 0), (0, pad_i)))
        b1_gate = jnp.pad(b1_gate, ((0, 0), (0, pad_i)))
        w2 = jnp.pad(w2, ((0, pad_i), (0, 0)))

    grid = (Mp // TM, Ip // TI)

    # VMEM budget: double-buffered streamed tiles + resident f32 accumulator.
    vmem_need = (
        2 * (TM * hidden          # x tile
             + 2 * hidden * TI    # w1 value + gate tiles
             + 2 * TI             # b1 halves
             + TI * hidden        # w2 tile
             + hidden             # b2
             + TM * hidden)       # out tile
        * itemsize
        + TM * hidden * 4         # f32 accumulator
    )
    vmem_limit = int(min(max(2 * vmem_need, 32 * 1024 * 1024), 96 * 1024 * 1024))

    out2d = pl.pallas_call(
        _ff_kernel,
        out_shape=jax.ShapeDtypeStruct((Mp, hidden), x.dtype),
        grid_spec=pltpu.PrefetchScalarGridSpec(
            num_scalar_prefetch=0,
            grid=grid,
            in_specs=[
                pl.BlockSpec((TM, hidden), lambda i, k: (i, 0)),   # x
                pl.BlockSpec((hidden, TI), lambda i, k: (0, k)),   # w1_val
                pl.BlockSpec((hidden, TI), lambda i, k: (0, k)),   # w1_gate
                pl.BlockSpec((1, TI), lambda i, k: (0, k)),        # b1_val
                pl.BlockSpec((1, TI), lambda i, k: (0, k)),        # b1_gate
                pl.BlockSpec((TI, hidden), lambda i, k: (k, 0)),   # w2
                pl.BlockSpec((1, hidden), lambda i, k: (0, 0)),    # b2
            ],
            out_specs=pl.BlockSpec((TM, hidden), lambda i, k: (i, 0)),
            scratch_shapes=[pltpu.VMEM((TM, hidden), jnp.float32)],
        ),
        compiler_params=pltpu.CompilerParams(
            dimension_semantics=("parallel", "arbitrary"),
            vmem_limit_bytes=vmem_limit),
        cost_estimate=pl.CostEstimate(
            flops=flops,
            transcendentals=M * inner,
            bytes_accessed=bytes_accessed),
    )(x2d, w1_val, w1_gate, b1_val, b1_gate, w2, b2_2d)

    if Mp != M:
        out2d = out2d[:M]
    return out2d.reshape(batch, seq, hidden)


def init_params(key, hidden=32, multiplier=4, dtype=jnp.float32):
    """Deterministic nn.Linear-style (uniform +/- 1/sqrt(fan_in)) init."""
    inner = hidden * multiplier
    k1, k2, k3, k4 = jax.random.split(key, 4)
    bound1 = 1.0 / math.sqrt(hidden)
    bound2 = 1.0 / math.sqrt(inner)
    w1 = jax.random.uniform(k1, (hidden, 2 * inner), dtype, -bound1, bound1)
    b1 = jax.random.uniform(k2, (2 * inner,), dtype, -bound1, bound1)
    w2 = jax.random.uniform(k3, (inner, hidden), dtype, -bound2, bound2)
    b2 = jax.random.uniform(k4, (hidden,), dtype, -bound2, bound2)
    return w1, b1, w2, b2


if __name__ == "__main__":
    hidden, multiplier = 32, 4
    batch, seq = 2, 8

    key = jax.random.PRNGKey(0)
    kx, kp = jax.random.split(key)
    x = jax.random.normal(kx, (batch, seq, hidden), dtype=jnp.float32)
    w1, b1, w2, b2 = init_params(kp, hidden, multiplier)

    out = feed_forward(x, w1, b1, w2, b2)
    out = jax.block_until_ready(out)

    # Reference check in plain JAX (same math as the PyTorch module).
    inner = hidden * multiplier
    h = x.reshape(-1, hidden) @ w1 + b1
    val, gate = h[:, :inner], h[:, inner:]
    ref = (val * (0.5 * gate * (1.0 + jax.lax.erf(gate / jnp.sqrt(2.0))))) @ w2 + b2
    ref = ref.reshape(batch, seq, hidden)
    assert jnp.allclose(out, ref, atol=1e-5, rtol=1e-5), "mismatch vs reference"

    print("KERNEL_OK")
</pallas_src>

<mosaic_0001>
module attributes {stable_mosaic.version = 11 : i64} {
  func.func @_ff_kernel(%arg0: i32, %arg1: i32, %arg2: memref<16x32xf32, #tpu.memory_space<vmem>>, %arg3: memref<32x128xf32, #tpu.memory_space<vmem>>, %arg4: memref<32x128xf32, #tpu.memory_space<vmem>>, %arg5: memref<1x128xf32, #tpu.memory_space<vmem>>, %arg6: memref<1x128xf32, #tpu.memory_space<vmem>>, %arg7: memref<128x32xf32, #tpu.memory_space<vmem>>, %arg8: memref<1x32xf32, #tpu.memory_space<vmem>>, %arg9: memref<16x32xf32, #tpu.memory_space<vmem>>, %arg10: memref<16x32xf32, #tpu.memory_space<vmem>>) attributes {dimension_semantics = [#tpu.dimension_semantics<parallel>, #tpu.dimension_semantics<arbitrary>], iteration_bounds = array<i64: 1, 1>, scalar_prefetch = 0 : i64, scratch_operands = 1 : i64, tpu.core_type = #tpu.core_type<tc>, window_params = [{transform_indices = @transform_0, window_bounds = array<i64: 16, 32>}, {transform_indices = @transform_1, window_bounds = array<i64: 32, 128>}, {transform_indices = @transform_2, window_bounds = array<i64: 32, 128>}, {transform_indices = @transform_3, window_bounds = array<i64: 1, 128>}, {transform_indices = @transform_4, window_bounds = array<i64: 1, 128>}, {transform_indices = @transform_5, window_bounds = array<i64: 128, 32>}, {pipeline_mode = #tpu.pipeline_mode<synchronous>, transform_indices = @transform_6, window_bounds = array<i64: 1, 32>}, {transform_indices = @transform_7, window_bounds = array<i64: 16, 32>}]} {
    %c0_i32 = arith.constant 0 : i32
    %0 = arith.cmpi eq, %arg1, %c0_i32 : i32
    %1 = arith.extui %0 : i1 to i32
    %c0_i32_0 = arith.constant 0 : i32
    %2 = arith.cmpi ne, %1, %c0_i32_0 : i32
    scf.if %2 {
      %cst_23 = arith.constant 0.000000e+00 : f32
      %31 = vector.broadcast %cst_23 : f32 to vector<16x32xf32>
      %c0_24 = arith.constant 0 : index
      %c0_25 = arith.constant 0 : index
      %32 = vector.load %arg10[%c0_24, %c0_25] : memref<16x32xf32, #tpu.memory_space<vmem>>, vector<16x32xf32>
      tpu.vector_store %arg10[%c0_24, %c0_25], %31 {strides = array<i32>} : memref<16x32xf32, #tpu.memory_space<vmem>>, vector<16x32xf32>,
    } else {
    }
    %c0 = arith.constant 0 : index
    %c0_1 = arith.constant 0 : index
    %3 = vector.load %arg2[%c0, %c0_1] : memref<16x32xf32, #tpu.memory_space<vmem>>, vector<16x32xf32>
    %c0_2 = arith.constant 0 : index
    %c0_3 = arith.constant 0 : index
    %4 = vector.load %arg3[%c0_2, %c0_3] : memref<32x128xf32, #tpu.memory_space<vmem>>, vector<32x128xf32>
    %cst = arith.constant dense<0.000000e+00> : vector<16x128xf32>
    %5 = tpu.matmul %3, %4, %cst {dimension_numbers = #tpu.dot_dimension_numbers<[1], [0], [0], [1], [0, 0, 1, 1], [], []>} : vector<16x32xf32>, vector<32x128xf32>, vector<16x128xf32> -> vector<16x128xf32>
    %c0_4 = arith.constant 0 : index
    %c0_5 = arith.constant 0 : index
    %6 = vector.load %arg5[%c0_4, %c0_5] : memref<1x128xf32, #tpu.memory_space<vmem>>, vector<1x128xf32>
    %7 = vector.broadcast %6 : vector<1x128xf32> to vector<16x128xf32>
    %8 = arith.addf %5, %7 : vector<16x128xf32>
    %c0_6 = arith.constant 0 : index
    %c0_7 = arith.constant 0 : index
    %9 = vector.load %arg4[%c0_6, %c0_7] : memref<32x128xf32, #tpu.memory_space<vmem>>, vector<32x128xf32>
    %cst_8 = arith.constant dense<0.000000e+00> : vector<16x128xf32>
    %10 = tpu.matmul %3, %9, %cst_8 {dimension_numbers = #tpu.dot_dimension_numbers<[1], [0], [0], [1], [0, 0, 1, 1], [], []>} : vector<16x32xf32>, vector<32x128xf32>, vector<16x128xf32> -> vector<16x128xf32>
    %c0_9 = arith.constant 0 : index
    %c0_10 = arith.constant 0 : index
    %11 = vector.load %arg6[%c0_9, %c0_10] : memref<1x128xf32, #tpu.memory_space<vmem>>, vector<1x128xf32>
    %12 = vector.broadcast %11 : vector<1x128xf32> to vector<16x128xf32>
    %13 = arith.addf %10, %12 : vector<16x128xf32>
    %cst_11 = arith.constant 5.000000e-01 : f32
    %14 = vector.broadcast %cst_11 : f32 to vector<16x128xf32>
    %15 = arith.mulf %14, %13 : vector<16x128xf32>
    %cst_12 = arith.constant 0.707106769 : f32
    %16 = vector.broadcast %cst_12 : f32 to vector<16x128xf32>
    %17 = arith.mulf %13, %16 : vector<16x128xf32>
    %18 = math.erf %17 : vector<16x128xf32>
    %cst_13 = arith.constant 1.000000e+00 : f32
    %19 = vector.broadcast %cst_13 : f32 to vector<16x128xf32>
    %20 = arith.addf %19, %18 : vector<16x128xf32>
    %21 = arith.mulf %15, %20 : vector<16x128xf32>
    %22 = arith.mulf %8, %21 : vector<16x128xf32>
    %c0_14 = arith.constant 0 : index
    %c0_15 = arith.constant 0 : index
    %23 = vector.load %arg10[%c0_14, %c0_15] : memref<16x32xf32, #tpu.memory_space<vmem>>, vector<16x32xf32>
    %c0_16 = arith.constant 0 : index
    %c0_17 = arith.constant 0 : index
    %24 = vector.load %arg7[%c0_16, %c0_17] : memref<128x32xf32, #tpu.memory_space<vmem>>, vector<128x32xf32>
    %cst_18 = arith.constant dense<0.000000e+00> : vector<16x32xf32>
    %25 = tpu.matmul %22, %24, %cst_18 {dimension_numbers = #tpu.dot_dimension_numbers<[1], [0], [0], [1], [0, 0, 1, 1], [], []>} : vector<16x128xf32>, vector<128x32xf32>, vector<16x32xf32> -> vector<16x32xf32>
    %26 = arith.addf %23, %25 : vector<16x32xf32>
    %c0_19 = arith.constant 0 : index
    %c0_20 = arith.constant 0 : index
    %27 = vector.load %arg10[%c0_19, %c0_20] : memref<16x32xf32, #tpu.memory_space<vmem>>, vector<16x32xf32>
    tpu.vector_store %arg10[%c0_19, %c0_20], %26 {strides = array<i32>} : memref<16x32xf32, #tpu.memory_space<vmem>>, vector<16x32xf32>,
    %c0_i32_21 = arith.constant 0 : i32
    %28 = arith.cmpi eq, %arg1, %c0_i32_21 : i32
    %29 = arith.extui %28 : i1 to i32
    %c0_i32_22 = arith.constant 0 : i32
    %30 = arith.cmpi ne, %29, %c0_i32_22 : i32
    scf.if %30 {
      %c0_23 = arith.constant 0 : index
      %c0_24 = arith.constant 0 : index
      %31 = vector.load %arg10[%c0_23, %c0_24] : memref<16x32xf32, #tpu.memory_space<vmem>>, vector<16x32xf32>
      %c0_25 = arith.constant 0 : index
      %c0_26 = arith.constant 0 : index
      %32 = vector.load %arg8[%c0_25, %c0_26] : memref<1x32xf32, #tpu.memory_space<vmem>>, vector<1x32xf32>
      %33 = vector.broadcast %32 : vector<1x32xf32> to vector<16x32xf32>
      %34 = arith.addf %31, %33 : vector<16x32xf32>
      %c0_27 = arith.constant 0 : index
      %c0_28 = arith.constant 0 : index
      %35 = vector.load %arg9[%c0_27, %c0_28] : memref<16x32xf32, #tpu.memory_space<vmem>>, vector<16x32xf32>
      tpu.vector_store %arg9[%c0_27, %c0_28], %34 {strides = array<i32>} : memref<16x32xf32, #tpu.memory_space<vmem>>, vector<16x32xf32>,
    } else {
    }
    return
  }
  func.func @transform_0(%arg0: i32, %arg1: i32) -> (i32, i32) {
    %c0_i32 = arith.constant 0 : i32
    %c0_i32_0 = arith.constant 0 : i32
    return %arg0, %c0_i32 : i32, i32
  }
  func.func @transform_1(%arg0: i32, %arg1: i32) -> (i32, i32) {
    %c0_i32 = arith.constant 0 : i32
    %c0_i32_0 = arith.constant 0 : i32
    return %c0_i32, %arg1 : i32, i32
  }
  func.func @transform_2(%arg0: i32, %arg1: i32) -> (i32, i32) {
    %c0_i32 = arith.constant 0 : i32
    %c0_i32_0 = arith.constant 0 : i32
    return %c0_i32, %arg1 : i32, i32
  }
  func.func @transform_3(%arg0: i32, %arg1: i32) -> (i32, i32) {
    %c0_i32 = arith.constant 0 : i32
    %c0_i32_0 = arith.constant 0 : i32
    return %c0_i32, %arg1 : i32, i32
  }
  func.func @transform_4(%arg0: i32, %arg1: i32) -> (i32, i32) {
    %c0_i32 = arith.constant 0 : i32
    %c0_i32_0 = arith.constant 0 : i32
    return %c0_i32, %arg1 : i32, i32
  }
  func.func @transform_5(%arg0: i32, %arg1: i32) -> (i32, i32) {
    %c0_i32 = arith.constant 0 : i32
    %c0_i32_0 = arith.constant 0 : i32
    return %arg1, %c0_i32 : i32, i32
  }
  func.func @transform_6(%arg0: i32, %arg1: i32) -> (i32, i32) {
    %c0_i32 = arith.constant 0 : i32
    %c0_i32_0 = arith.constant 0 : i32
    %c0_i32_1 = arith.constant 0 : i32
    return %c0_i32, %c0_i32_0 : i32, i32
  }
  func.func @transform_7(%arg0: i32, %arg1: i32) -> (i32, i32) {
    %c0_i32 = arith.constant 0 : i32
    %c0_i32_0 = arith.constant 0 : i32
    return %arg0, %c0_i32 : i32, i32
  }
}

</mosaic_0001>

<bundles_post_ra>
// kernel: tpu_custom_call.1
= control target key start
LH: loop header
LB: loop body
LE: loop exit
PB: predicated region body
PF: predicated region fallthrough
CT: control target
= control target key end

     0   :  { %vm31_vm0 = vcmask 261120   ;;  %s683_s0 = inlined_call_operand.vmem [shape: f32[16,32], index: 0, kind: input, shape index: {}]   ;;  %s684_s1 = inlined_call_operand.vmem [shape: f32[32,128], index: 1, kind: input, shape index: {}]   ;;  %s685_s2 = inlined_call_operand.vmem [shape: f32[32,128], index: 2, kind: input, shape index: {}]   ;;  %s686_s3 = inlined_call_operand.vmem [shape: f32[1,128], index: 3, kind: input, shape index: {}]   ;;  %s687_s4 = inlined_call_operand.vmem [shape: f32[1,128], index: 4, kind: input, shape index: {}]   ;;  %s688_s5 = inlined_call_operand.vmem [shape: f32[128,32], index: 5, kind: input, shape index: {}]   ;;  %s689_s6 = inlined_call_operand.vmem [shape: f32[1,32], index: 6, kind: input, shape index: {}]   ;;  %s690_s7 = inlined_call_operand.hbm [shape: f32[16,32], index: 7, kind: output, shape index: {}]  }
   0x1   :  { %v36_v0 = vld [vmem:[%s684_s1] sm:$0xff]  ;;  %v37_v1 = vld [vmem:[%s684_s1 + $0x8] sm:$0xff]  ;;  %v38_v2 = vld [vmem:[%s684_s1 + $0x10] sm:$0xff] }
   0x2   :  { %v450_v3 = vpack.c.bf16 %v37_v1, %v36_v0  ;;  %v39_v4 = vld [vmem:[%s684_s1 + $0x18] sm:$0xff]  ;;  %v34_v5 = vld [vmem:[%s683_s0] sm:$0xff]  ;;  %v130_v8 = vld [vmem:[%s685_s2 + $0x8] sm:$0xff] }
   0x3   :  { %v454_v6 = vpack.c.bf16 %v39_v4, %v38_v2  ;;  %401 = vmatprep.mubr.msk.f32.mxu1 %vm31_vm0, %v34_v5  ;;  %v129_v7 = vld [vmem:[%s685_s2] sm:$0xff] }
   0x4   :  { %451 = vmatprep.subr.bf16.mxu1 %v450_v3 }
   0x5   :  { %12 = vsyncpa [#allocation4], 0  ;;  %453 = vmatpush3.bf16.msra.mxu1 %v450_v3  ;;  %v458_v9 = vpack.c.bf16 %v130_v8, %v129_v7  ;;  %v131_v10 = vld [vmem:[%s685_s2 + $0x10] sm:$0xff]  ;;  %v132_v11 = vld [vmem:[%s685_s2 + $0x18] sm:$0xff]  ;;  %v530_v38 = vmov 0.0   ;;  %s531_s27 = smov [#allocation3]  }
   0x6   :  { %455 = vmatprep.subr.bf16.mxu1 %v454_v6  ;;  %v35_v12 = vld [vmem:[%s683_s0 + $0x8] sm:$0xff]  ;;  %v462_v13 = vpack.c.bf16 %v132_v11, %v131_v10  ;;  %v229_v14 = vld [vmem:[%s688_s5] sm:$0xff]  ;;  %v231_v17 = vld [vmem:[%s688_s5 + $0x10] sm:$0xff]  ;;  %33 = vst.msk [vmem:[#allocation2 + $0x8] sm:$0xff] %vm31_vm0, %v530_v38  ;;  %s345_s28 = sshll.u32 %s531_s27, 4  ;;  %s346_s28 = int_to_ptr.vmem [resolvable:$true] %s345_s28 }
   0x7   :  { %v230_v15 = vld [vmem:[%s688_s5 + $0x8] sm:$0xff]  ;;  %v232_v18 = vld [vmem:[%s688_s5 + $0x18] sm:$0xff]  ;;  %v233_v20 = vld [vmem:[%s688_s5 + $0x20] sm:$0xff]  ;;  %32 = vst.msk [vmem:[#allocation2] sm:$0xff] %vm31_vm0, %v530_v38  ;;  %s506_s29 = scalar_lea.vmem %s346_s28, 256  ;;  %p511_p1 = scmp.lt.s32.totalorder %s346_s28, %s346_s28 }
   0x8   :  { %v466_v16 = vpack.c.bf16 %v230_v15, %v229_v14  ;;  %v470_v19 = vpack.c.bf16 %v232_v18, %v231_v17  ;;  %v234_v21 = vld [vmem:[%s688_s5 + $0x28] sm:$0xff]  ;;  %v235_v23 = vld [vmem:[%s688_s5 + $0x30] sm:$0xff]  ;;  %v236_v24 = vld [vmem:[%s688_s5 + $0x38] sm:$0xff]  ;;  %p507_p0 = scmp.ne.s32.totalorder %s346_s28, %s506_s29  ;;  %p512_p2 = scmp.lt.s32.totalorder %s506_s29, %s506_s29 }
   0x9   :  { %457 = vmatpush3.bf16.msra.mxu1 %v454_v6  ;;  %v474_v22 = vpack.c.bf16 %v234_v21, %v233_v20  ;;  %v478_v25 = vpack.c.bf16 %v236_v24, %v235_v23  ;;  %v237_v26 = vld [vmem:[%s688_s5 + $0x40] sm:$0xff]  ;;  %v238_v27 = vld [vmem:[%s688_s5 + $0x48] sm:$0xff]  ;;  %v239_v29 = vld [vmem:[%s688_s5 + $0x50] sm:$0xff] }
   0xa   :  { %459 = vmatprep.subr.bf16.mxu1 %v458_v9  ;;  %467 = vmatprep.subr.bf16.mxu0 %v466_v16  ;;  %v482_v28 = vpack.c.bf16 %v238_v27, %v237_v26  ;;  %v240_v30 = vld [vmem:[%s688_s5 + $0x58] sm:$0xff]  ;;  %v241_v32 = vld [vmem:[%s688_s5 + $0x60] sm:$0xff]  ;;  %v242_v33 = vld [vmem:[%s688_s5 + $0x68] sm:$0xff]  ;;  %p513_p3 = por %p512_p2, %p511_p1 }
   0xb   :  { %469 = vmatpush3.bf16.msra.mxu0 %v466_v16  ;;  %v486_v31 = vpack.c.bf16 %v240_v30, %v239_v29  ;;  %v490_v34 = vpack.c.bf16 %v242_v33, %v241_v32  ;;  %v243_v35 = vld [vmem:[%s688_s5 + $0x70] sm:$0xff]  ;;  %v244_v36 = vld [vmem:[%s688_s5 + $0x78] sm:$0xff]  ;;  %v359_v41 = vld [vmem:[%s687_s4] ss:$0 sm:$0xff] }
   0xc   :  { %402 = vmatmul.mubr.msk.f32.vlgmr.msra.gmra.mrb[0].mxu1 %vm31_vm0, %v35_v12  ;;  %471 = vmatprep.subr.bf16.mxu0 %v470_v19  ;;  %v494_v37 = vpack.c.bf16 %v244_v36, %v243_v35  ;;  %v356_v49 = vld [vmem:[%s686_s3] ss:$0 sm:$0xff]  ;;  %p514_p4 = pnand %p513_p3, %p507_p0 }
   0xd   :  { %461 = vmatpush3.bf16.msra.mxu1 %v458_v9  ;;  %412 = vmatprep.mubr.msk.f32.mxu1 %vm31_vm0, %v34_v5  ;;  %v228_v61 = vld [vmem:[#allocation2 + $0x8] sm:$0xff]  ;;  %v362_v3 = vld [vmem:[%s689_s6] ss:$0 sm:$0xff] }
   0xe   :  { %463 = vmatprep.subr.bf16.mxu1 %v462_v13  ;;  %v227_v62 = vld [vmem:[#allocation2] sm:$0xff] }
   0xf   :  { %473 = vmatpush3.bf16.msra.mxu0 %v470_v19 }
  0x10   :  { %475 = vmatprep.subr.bf16.mxu0 %v474_v22 }
  0x11   :  { %465 = vmatpush3.bf16.msra.mxu1 %v462_v13 }
  0x13   :  { %477 = vmatpush3.bf16.msra.mxu0 %v474_v22 }
  0x14   :  { %413 = vmatmul.mubr.msk.f32.vlgmr.msra.gmra.mrb[2].mxu1 %vm31_vm0, %v35_v12  ;;  %479 = vmatprep.subr.bf16.mxu0 %v478_v25 }
  0x17   :  { %481 = vmatpush3.bf16.msra.mxu0 %v478_v25 }
  0x18   :  { %483 = vmatprep.subr.bf16.mxu0 %v482_v28 }
  0x1b   :  { %485 = vmatpush3.bf16.msra.mxu0 %v482_v28 }
  0x1c   :  { %487 = vmatprep.subr.bf16.mxu0 %v486_v31 }
  0x1f   :  { %489 = vmatpush3.bf16.msra.mxu0 %v486_v31 }
  0x20   :  { %491 = vmatprep.subr.bf16.mxu0 %v490_v34 }
  0x23   :  { %493 = vmatpush3.bf16.msra.mxu0 %v490_v34 }
  0x24   :  { %495 = vmatprep.subr.bf16.mxu0 %v494_v37 }
  0x27   :  { %497 = vmatpush3.bf16.msra.mxu0 %v494_v37 }
  0xdf   :  { %v403_v39 = vpop.f32.mrb[0].mxu1 }
  0xe0   :  { %v120_v40 = vpop.f32.mrb[1].mxu1  ;;  %v126_v55 = vadd.f32 %v403_v39, %v356_v49 }
  0xe1   :  { %v121_v57 = vadd.f32 %v356_v49, %v120_v40 }
  0xe7   :  { %v414_v42 = vpop.f32.mrb[2].mxu1 }
  0xe8   :  { %v212_v43 = vadd.f32 %v414_v42, %v359_v41  ;;  %v206_v44 = vpop.f32.mrb[3].mxu1 }
  0xe9   :  { %v207_v45 = vadd.f32 %v359_v41, %v206_v44 }
  0xea   :  { %v218_v46 = vmul.f32 0.70710677, %v212_v43  ;;  %v216_v51 = vmul.f32 0.5, %v212_v43 }
  0xeb   :  { %v217_v47 = vmul.f32 0.70710677, %v207_v45  ;;  %v215_v53 = vmul.f32 0.5, %v207_v45 }
  0xec   :  { %502 = verf.f32 %v218_v46 }
  0xed   :  { %504 = verf.f32 %v217_v47 }
  0xf6   :  { %v503_v48 = vpop.eup %502 }
  0xf7   :  { %v505_v50 = vpop.eup %504  ;;  %v222_v52 = vadd.f32 1.0, %v503_v48 }
  0xf8   :  { %v221_v54 = vadd.f32 1.0, %v505_v50 }
  0xf9   :  { %v224_v56 = vmul.f32 %v222_v52, %v216_v51 }
  0xfa   :  { %v223_v58 = vmul.f32 %v221_v54, %v215_v53 }
  0xfb   :  { %v226_v59 = vmul.f32 %v224_v56, %v126_v55 }
  0xfc   :  { %v225_v60 = vmul.f32 %v223_v58, %v121_v57 }
  0xfe   :  { %447 = vmatprep.mubr.f32.mxu0 %v225_v60 }
  0xff   :  { %448 = vmatmul.mubr.f32.vlgmr.msra.gmra.mrb[0].mxu0 %v226_v59 }
 0x1d2   :  { %v449_v63 = vpop.f32.mrb[0].mxu0 }
 0x1d3   :  { %v321_v0 = vadd.f32 %v449_v63, %v228_v61  ;;  %v311_v1 = vpop.f32.mrb[1].mxu0 }
 0x1d4   :  { %v320_v2 = vadd.f32 %v311_v1, %v227_v62 }
 0x1d5   :  { %323 = vst.msk [vmem:[#allocation2 + $0x8] sm:$0xff] %vm31_vm0, %v321_v0 }
 0x1d6   :  { %322 = vst.msk [vmem:[#allocation2] sm:$0xff] %vm31_vm0, %v320_v2 }
 0x1dc   :  { %v328_v4 = vld [vmem:[#allocation2 + $0x8] sm:$0xff] }
 0x1dd   :  { %v327_v5 = vld [vmem:[#allocation2] sm:$0xff]  ;;  %v337_v6 = vadd.f32 %v362_v3, %v328_v4 }
 0x1de   :  { %v336_v7 = vadd.f32 %v362_v3, %v327_v5 }
 0x1df   :  { %339 = vst.msk [vmem:[#allocation3 + $0x8] sm:$0xff] %vm31_vm0, %v337_v6 }
 0x1e0   :  { %338 = vst.msk [vmem:[#allocation3] sm:$0xff] %vm31_vm0, %v336_v7 }
 0x1e1   :  { %517 = shalt.err (!%p514_p4)
}
 0x1e2   :  { %s518_s8 = scalar_lea.hbm %s690_s7, 256 }
 0x1e3   :  { %p519_p5 = scmp.ne.s32.totalorder %s690_s7, %s518_s8  ;;  %p522_p6 = scmp.lt.u32.totalorder %s518_s8, %s690_s7 }
 0x1e5   :  { %p524_p7 = pnand %p522_p6, %p519_p5 }
 0x1e7   :  { %527 = shalt.err (!%p524_p7)
}
 0x1e8   :  { %s532_s13 = smov 128   ;;  %s533_s14 = smov 8  }
 0x1e9   :  { %351 = dma.vmem_to_hbm [thread:$0]  %s346_s28, 256, %s690_s7, [#allocation4], %s532_s13, %s532_s13, %s533_s14  }
 0x1ea   :  { %528 = dma.done.wait [#allocation4], 256  }
 0x1eb   :  { %529 = vsyncadd [#allocation4], 4294967040 }
 0x1ec   :  { %355 = vsyncpa [#allocation4], 1 }

</bundles_post_ra>
